<compile_context>
chip_gen: v7x
topology: tpu7x:2x2x1
jax: 0.10.0
libtpu: 0.0.40
codegen_flags: <defaults>
</compile_context>

<pallas_src>
import jax
import jax.numpy as jnp
import numpy as np
from jax.experimental import pallas as pl
from jax.experimental.pallas import tpu as pltpu


N_OUT = 10    # true logit width
N_PAD = 128   # lane-dense padded logit width (cols [N_OUT:] are exactly zero)


def mlp_kernel(x_ref, w1_ref, b1_ref, w2_ref, b2_ref, w3_ref, b3_ref, o_ref):
    # Layer 1: Linear(784, 64) + ReLU   (bf16 operands, f32 MXU accumulation)
    h1 = jnp.dot(x_ref[...], w1_ref[...], preferred_element_type=jnp.float32)
    h1 = jnp.maximum(h1 + b1_ref[...], 0.0).astype(jnp.bfloat16)
    # Layer 2: Linear(64, 64) + ReLU
    h2 = jnp.dot(h1, w2_ref[...], preferred_element_type=jnp.float32)
    h2 = jnp.maximum(h2 + b2_ref[...], 0.0).astype(jnp.bfloat16)
    # Layer 3: Linear(64, 128-padded) — logits live in columns [:10]
    out = jnp.dot(h2, w3_ref[...], preferred_element_type=jnp.float32)
    o_ref[...] = (out + b3_ref[...]).astype(o_ref.dtype)


def _round_up(n, m):
    return ((n + m - 1) // m) * m


def prepare_params(params):
    """One-time parameter prep (hoisted out of the per-call wrapper):
    bf16 weights, f32 biases, layer-3 zero-padded to N_PAD lanes."""
    w1, b1, w2, b2, w3, b3 = params
    w3p = jnp.zeros((w3.shape[0], N_PAD), jnp.float32).at[:, :w3.shape[1]].set(w3)
    b3p = jnp.zeros((1, N_PAD), jnp.float32).at[:, :b3.shape[1]].set(b3)
    return (
        w1.astype(jnp.bfloat16), b1.astype(jnp.float32),
        w2.astype(jnp.bfloat16), b2.astype(jnp.float32),
        w3p.astype(jnp.bfloat16), b3p.astype(jnp.float32),
    )


def _pick_tile(B, max_tile):
    # Target >= 2 grid steps (so v7x can shard the parallel batch axis across
    # both TensorCores); tile rows are a multiple of 8 sublanes.
    tb = _round_up(max(1, pl.cdiv(B, 2)), 8)
    return max(8, min(max_tile, tb))


def net_shallow_forward(x, prepped_params, *, max_tile=4096):
    """x: (B, 1, 28, 28) float.  prepped_params from prepare_params().
    Returns logits (B, 10).  Call under jax.jit so the final slice fuses."""
    w1, b1, w2, b2, w3p, b3p = prepped_params
    B = x.shape[0]
    # Same flattening as torch x.view(B, -1); stream activations as bf16
    # (f32 accumulation happens on the MXU inside the kernel).
    x_flat = x.reshape(B, -1).astype(jnp.bfloat16)
    IN = x_flat.shape[1]
    assert IN == 784

    TB = _pick_tile(B, max_tile)
    grid = (pl.cdiv(B, TB),)   # ragged tail handled by Pallas boundary masking

    const = lambda shape: pl.BlockSpec(shape, lambda i: (0,) * len(shape))

    out = pl.pallas_call(
        mlp_kernel,
        out_shape=jax.ShapeDtypeStruct((B, N_PAD), jnp.float32),
        grid=grid,
        in_specs=[
            # TODO(synk): sweep pipeline_mode=pl.Buffered(3) for x on v7x
            # (fast HBM + short per-step compute) — small win, VMEM permitting.
            pl.BlockSpec((TB, IN), lambda i: (i, 0)),    # x: tiled over batch
            const(w1.shape), const(b1.shape),            # weights/biases pinned
            const(w2.shape), const(b2.shape),            # in VMEM (constant
            const(w3p.shape), const(b3p.shape),          # block index)
        ],
        out_specs=pl.BlockSpec((TB, N_PAD), lambda i: (i, 0)),
        compiler_params=pltpu.CompilerParams(
            dimension_semantics=("parallel",),
            # TB=4096 bf16 x (~12.5 MiB dbl-buffered) + f32 out (~4 MiB) +
            # weights (<0.3 MiB) ≈ 17 MiB; raise the scoped cap so this also
            # fits v5e's 16 MiB default while staying far under v7x's 64 MiB
            # physical VMEM.
            vmem_limit_bytes=40 << 20,
        ),
    )(x_flat, w1, b1, w2, b2, w3p, b3p)

    return out[:B, :N_OUT]


def init_params(key):
    """Deterministic init matching nn.Linear default (uniform +/- 1/sqrt(fan_in)).
    Weights stored (in_features, out_features)."""
    dims = [(784, 64), (64, 64), (64, 10)]
    params = []
    for i, (fin, fout) in enumerate(dims):
        kw, kb = jax.random.split(jax.random.fold_in(key, i))
        bound = 1.0 / np.sqrt(fin)
        w = jax.random.uniform(kw, (fin, fout), jnp.float32, -bound, bound)
        b = jax.random.uniform(kb, (1, fout), jnp.float32, -bound, bound)
        params += [w, b]
    return tuple(params)


def reference_forward(x, params):
    w1, b1, w2, b2, w3, b3 = params
    h = x.reshape(x.shape[0], -1).astype(jnp.float32)
    h = jnp.maximum(h @ w1 + b1, 0.0)
    h = jnp.maximum(h @ w2 + b2, 0.0)
    return h @ w3 + b3


if __name__ == "__main__":
    key = jax.random.PRNGKey(0)
    kx, kp = jax.random.split(key)

    # Small shapes consistent with forward(): flattens to 784 features (1x28x28).
    x = jax.random.normal(kx, (2, 1, 28, 28), jnp.float32)
    params = init_params(kp)
    prepped = prepare_params(params)

    fwd = jax.jit(net_shallow_forward)
    out = jax.block_until_ready(fwd(x, prepped))

    ref = reference_forward(x, params)
    # bf16 streaming with f32 accumulation: relax tolerance vs. the f32 path.
    np.testing.assert_allclose(np.asarray(out), np.asarray(ref), rtol=2e-2, atol=2e-2)

    print("KERNEL_OK")
</pallas_src>

<mosaic_0001>
module attributes {stable_mosaic.version = 11 : i64} {
  func.func @mlp_kernel(%arg0: i32, %arg1: memref<8x784xbf16, #tpu.memory_space<vmem>>, %arg2: memref<784x64xbf16, #tpu.memory_space<vmem>>, %arg3: memref<1x64xf32, #tpu.memory_space<vmem>>, %arg4: memref<64x64xbf16, #tpu.memory_space<vmem>>, %arg5: memref<1x64xf32, #tpu.memory_space<vmem>>, %arg6: memref<64x128xbf16, #tpu.memory_space<vmem>>, %arg7: memref<1x128xf32, #tpu.memory_space<vmem>>, %arg8: memref<8x128xf32, #tpu.memory_space<vmem>>) attributes {dimension_semantics = [#tpu.dimension_semantics<parallel>], iteration_bounds = array<i64: 1>, scalar_prefetch = 0 : i64, scratch_operands = 0 : i64, tpu.core_type = #tpu.core_type<tc>, window_params = [{transform_indices = @transform_0, window_bounds = array<i64: 8, 784>}, {pipeline_mode = #tpu.pipeline_mode<synchronous>, transform_indices = @transform_1, window_bounds = array<i64: 784, 64>}, {pipeline_mode = #tpu.pipeline_mode<synchronous>, transform_indices = @transform_2, window_bounds = array<i64: 1, 64>}, {pipeline_mode = #tpu.pipeline_mode<synchronous>, transform_indices = @transform_3, window_bounds = array<i64: 64, 64>}, {pipeline_mode = #tpu.pipeline_mode<synchronous>, transform_indices = @transform_4, window_bounds = array<i64: 1, 64>}, {pipeline_mode = #tpu.pipeline_mode<synchronous>, transform_indices = @transform_5, window_bounds = array<i64: 64, 128>}, {pipeline_mode = #tpu.pipeline_mode<synchronous>, transform_indices = @transform_6, window_bounds = array<i64: 1, 128>}, {transform_indices = @transform_7, window_bounds = array<i64: 8, 128>}]} {
    %c0 = arith.constant 0 : index
    %c0_0 = arith.constant 0 : index
    %0 = vector.load %arg1[%c0, %c0_0] : memref<8x784xbf16, #tpu.memory_space<vmem>>, vector<8x784xbf16>
    %c0_1 = arith.constant 0 : index
    %c0_2 = arith.constant 0 : index
    %1 = vector.load %arg2[%c0_1, %c0_2] : memref<784x64xbf16, #tpu.memory_space<vmem>>, vector<784x64xbf16>
    %cst = arith.constant dense<0.000000e+00> : vector<8x64xf32>
    %2 = tpu.matmul %0, %1, %cst {dimension_numbers = #tpu.dot_dimension_numbers<[1], [0], [0], [1], [0, 0, 1, 1], [], []>} : vector<8x784xbf16>, vector<784x64xbf16>, vector<8x64xf32> -> vector<8x64xf32>
    %c0_3 = arith.constant 0 : index
    %c0_4 = arith.constant 0 : index
    %3 = vector.load %arg3[%c0_3, %c0_4] : memref<1x64xf32, #tpu.memory_space<vmem>>, vector<1x64xf32>
    %4 = vector.broadcast %3 : vector<1x64xf32> to vector<8x64xf32>
    %5 = arith.addf %2, %4 : vector<8x64xf32>
    %cst_5 = arith.constant 0.000000e+00 : f32
    %6 = vector.broadcast %cst_5 : f32 to vector<8x64xf32>
    %7 = arith.maximumf %5, %6 : vector<8x64xf32>
    %8 = arith.truncf %7 : vector<8x64xf32> to vector<8x64xbf16>
    %c0_6 = arith.constant 0 : index
    %c0_7 = arith.constant 0 : index
    %9 = vector.load %arg4[%c0_6, %c0_7] : memref<64x64xbf16, #tpu.memory_space<vmem>>, vector<64x64xbf16>
    %cst_8 = arith.constant dense<0.000000e+00> : vector<8x64xf32>
    %10 = tpu.matmul %8, %9, %cst_8 {dimension_numbers = #tpu.dot_dimension_numbers<[1], [0], [0], [1], [0, 0, 1, 1], [], []>} : vector<8x64xbf16>, vector<64x64xbf16>, vector<8x64xf32> -> vector<8x64xf32>
    %c0_9 = arith.constant 0 : index
    %c0_10 = arith.constant 0 : index
    %11 = vector.load %arg5[%c0_9, %c0_10] : memref<1x64xf32, #tpu.memory_space<vmem>>, vector<1x64xf32>
    %12 = vector.broadcast %11 : vector<1x64xf32> to vector<8x64xf32>
    %13 = arith.addf %10, %12 : vector<8x64xf32>
    %cst_11 = arith.constant 0.000000e+00 : f32
    %14 = vector.broadcast %cst_11 : f32 to vector<8x64xf32>
    %15 = arith.maximumf %13, %14 : vector<8x64xf32>
    %16 = arith.truncf %15 : vector<8x64xf32> to vector<8x64xbf16>
    %c0_12 = arith.constant 0 : index
    %c0_13 = arith.constant 0 : index
    %17 = vector.load %arg6[%c0_12, %c0_13] : memref<64x128xbf16, #tpu.memory_space<vmem>>, vector<64x128xbf16>
    %cst_14 = arith.constant dense<0.000000e+00> : vector<8x128xf32>
    %18 = tpu.matmul %16, %17, %cst_14 {dimension_numbers = #tpu.dot_dimension_numbers<[1], [0], [0], [1], [0, 0, 1, 1], [], []>} : vector<8x64xbf16>, vector<64x128xbf16>, vector<8x128xf32> -> vector<8x128xf32>
    %c0_15 = arith.constant 0 : index
    %c0_16 = arith.constant 0 : index
    %19 = vector.load %arg7[%c0_15, %c0_16] : memref<1x128xf32, #tpu.memory_space<vmem>>, vector<1x128xf32>
    %20 = vector.broadcast %19 : vector<1x128xf32> to vector<8x128xf32>
    %21 = arith.addf %18, %20 : vector<8x128xf32>
    %c0_17 = arith.constant 0 : index
    %c0_18 = arith.constant 0 : index
    %22 = vector.load %arg8[%c0_17, %c0_18] : memref<8x128xf32, #tpu.memory_space<vmem>>, vector<8x128xf32>
    tpu.vector_store %arg8[%c0_17, %c0_18], %21 {strides = array<i32>} : memref<8x128xf32, #tpu.memory_space<vmem>>, vector<8x128xf32>,
    return
  }
  func.func @transform_0(%arg0: i32) -> (i32, i32) {
    %c0_i32 = arith.constant 0 : i32
    %c0_i32_0 = arith.constant 0 : i32
    return %arg0, %c0_i32 : i32, i32
  }
  func.func @transform_1(%arg0: i32) -> (i32, i32) {
    %c0_i32 = arith.constant 0 : i32
    %c0_i32_0 = arith.constant 0 : i32
    %c0_i32_1 = arith.constant 0 : i32
    return %c0_i32, %c0_i32_0 : i32, i32
  }
  func.func @transform_2(%arg0: i32) -> (i32, i32) {
    %c0_i32 = arith.constant 0 : i32
    %c0_i32_0 = arith.constant 0 : i32
    %c0_i32_1 = arith.constant 0 : i32
    return %c0_i32, %c0_i32_0 : i32, i32
  }
  func.func @transform_3(%arg0: i32) -> (i32, i32) {
    %c0_i32 = arith.constant 0 : i32
    %c0_i32_0 = arith.constant 0 : i32
    %c0_i32_1 = arith.constant 0 : i32
    return %c0_i32, %c0_i32_0 : i32, i32
  }
  func.func @transform_4(%arg0: i32) -> (i32, i32) {
    %c0_i32 = arith.constant 0 : i32
    %c0_i32_0 = arith.constant 0 : i32
    %c0_i32_1 = arith.constant 0 : i32
    return %c0_i32, %c0_i32_0 : i32, i32
  }
  func.func @transform_5(%arg0: i32) -> (i32, i32) {
    %c0_i32 = arith.constant 0 : i32
    %c0_i32_0 = arith.constant 0 : i32
    %c0_i32_1 = arith.constant 0 : i32
    return %c0_i32, %c0_i32_0 : i32, i32
  }
  func.func @transform_6(%arg0: i32) -> (i32, i32) {
    %c0_i32 = arith.constant 0 : i32
    %c0_i32_0 = arith.constant 0 : i32
    %c0_i32_1 = arith.constant 0 : i32
    return %c0_i32, %c0_i32_0 : i32, i32
  }
  func.func @transform_7(%arg0: i32) -> (i32, i32) {
    %c0_i32 = arith.constant 0 : i32
    %c0_i32_0 = arith.constant 0 : i32
    return %arg0, %c0_i32 : i32, i32
  }
}

</mosaic_0001>

<bundles_post_ra>
// kernel: net_shallow_forward.1
= control target key start
LH: loop header
LB: loop body
LE: loop exit
PB: predicated region body
PF: predicated region fallthrough
CT: control target
= control target key end

     0   :  { %12 = vsyncpa [#allocation3], 0  ;;  %v148_v30 = vlaneseq  ;;  %v1122_v38 = vmov 1966171168   ;;  %v1123_v40 = vmov 0.0   ;;  %vm1124_vm0 = vmmov 0   ;;  %s1389_s0 = inlined_call_operand.vmem [shape: bf16[2,784], index: 0, kind: input, shape index: {}]   ;;  %s1390_s1 = inlined_call_operand.vmem [shape: bf16[784,64], index: 1, kind: input, shape index: {}]   ;;  %s1391_s2 = inlined_call_operand.vmem [shape: f32[1,64], index: 2, kind: input, shape index: {}]   ;;  %s1392_s3 = inlined_call_operand.vmem [shape: bf16[64,64], index: 3, kind: input, shape index: {}]   ;;  %s1393_s4 = inlined_call_operand.vmem [shape: f32[1,64], index: 4, kind: input, shape index: {}]   ;;  %s1394_s5 = inlined_call_operand.vmem [shape: bf16[64,128], index: 5, kind: input, shape index: {}]   ;;  %s1395_s6 = inlined_call_operand.vmem [shape: f32[1,128], index: 6, kind: input, shape index: {}]   ;;  %s1396_s7 = inlined_call_operand.hbm [shape: f32[2,128], index: 7, kind: output, shape index: {}]  }
   0x1   :  { %v1035_v0 = vld [vmem:[%s1390_s1 + $0x40] sm:$0xff]   ;;  %v1039_v4 = vld [vmem:[%s1390_s1 + $0x48] sm:$0xff]   ;;  %v1043_v8 = vld [vmem:[%s1390_s1 + $0x50] sm:$0xff]   ;;  %v146_v39 = vunpack.c.l.s4 %v1122_v38  ;;  %vm508_vm1 = vcmask 130048   ;;  %vm713_vm2 = vcmask 523264  }
   0x2   :  { %v1036_v1 = vld [vmem:[%s1390_s1] sm:$0xff]   ;;  %921 = vmatprep.subr.bf16.mxu0 %v1035_v0  ;;  %v1040_v5 = vld [vmem:[%s1390_s1 + $0x8] sm:$0xff]   ;;  %v1044_v9 = vld [vmem:[%s1390_s1 + $0x10] sm:$0xff]   ;;  %v149_v33 = vshrl.u32 %v148_v30, 7 }
   0x3   :  { %v1037_v2 = vld [vmem:[%s1390_s1 + $0xc0] sm:$0xff]   ;;  %922 = vmatpush3.bf16.msra.mxu0 %v1036_v1  ;;  %v1041_v6 = vld [vmem:[%s1390_s1 + $0xc8] sm:$0xff]   ;;  %v1045_v10 = vld [vmem:[%s1390_s1 + $0xd0] sm:$0xff]   ;;  %v147_v42 = vunpack.c.0.s8 %v146_v39 }
   0x4   :  { %v1038_v3 = vld [vmem:[%s1390_s1 + $0x80] sm:$0xff]   ;;  %943 = vmatprep.subr.bf16.mxu1 %v1037_v2  ;;  %923 = vmatprep.subr.bf16.mxu0 %v1039_v4  ;;  %v1042_v7 = vld [vmem:[%s1390_s1 + $0x88] sm:$0xff]   ;;  %v1046_v11 = vld [vmem:[%s1390_s1 + $0x90] sm:$0xff]  }
   0x5   :  { %944 = vmatpush3.bf16.msra.mxu1 %v1038_v3  ;;  %v1047_v12 = vld [vmem:[%s1390_s1 + $0x58] sm:$0xff]   ;;  %v1051_v16 = vld [vmem:[%s1390_s1 + $0x60] sm:$0xff]   ;;  %v1055_v20 = vld [vmem:[%s1390_s1 + $0x68] sm:$0xff]   ;;  %v150_v43 = vsub.s32 %v147_v42, %v149_v33 }
   0x6   :  { %945 = vmatprep.subr.bf16.mxu1 %v1041_v6  ;;  %v1048_v13 = vld [vmem:[%s1390_s1 + $0x18] sm:$0xff]   ;;  %v1052_v17 = vld [vmem:[%s1390_s1 + $0x20] sm:$0xff]   ;;  %v1056_v21 = vld [vmem:[%s1390_s1 + $0x28] sm:$0xff]  }
   0x7   :  { %924 = vmatpush3.bf16.msra.mxu0 %v1040_v5  ;;  %v1049_v14 = vld [vmem:[%s1390_s1 + $0xd8] sm:$0xff]   ;;  %v1053_v18 = vld [vmem:[%s1390_s1 + $0xe0] sm:$0xff]   ;;  %v1057_v22 = vld [vmem:[%s1390_s1 + $0xe8] sm:$0xff]  }
   0x8   :  { %925 = vmatprep.subr.bf16.mxu0 %v1043_v8  ;;  %v1050_v15 = vld [vmem:[%s1390_s1 + $0x98] sm:$0xff]   ;;  %v1054_v19 = vld [vmem:[%s1390_s1 + $0xa0] sm:$0xff]   ;;  %v1058_v23 = vld [vmem:[%s1390_s1 + $0xa8] sm:$0xff]  }
   0x9   :  { %946 = vmatpush3.bf16.msra.mxu1 %v1042_v7  ;;  %v1059_v24 = vld [vmem:[%s1390_s1 + $0x70] sm:$0xff]   ;;  %v1063_v28 = vld [vmem:[%s1390_s1 + $0x78] sm:$0xff]   ;;  %v1073_v34 = vld [vmem:[%s1390_s1 + $0x140] sm:$0xff]  }
   0xa   :  { %947 = vmatprep.subr.bf16.mxu1 %v1045_v10  ;;  %v1060_v25 = vld [vmem:[%s1390_s1 + $0x30] sm:$0xff]   ;;  %v1064_v29 = vld [vmem:[%s1390_s1 + $0x38] sm:$0xff]   ;;  %v1066_v35 = vld [vmem:[%s1389_s0] ss:$7 sps:$4 sm:$0xff]  }
   0xb   :  { %926 = vmatpush3.bf16.msra.mxu0 %v1044_v9  ;;  %v1061_v26 = vld [vmem:[%s1390_s1 + $0xf0] sm:$0xff]   ;;  %v1065_v31 = vld [vmem:[%s1390_s1 + $0xf8] sm:$0xff]   ;;  %v1068_v36 = vld [vmem:[%s1389_s0 + $0x4] ss:$7 sps:$4 sm:$0x77]   ;;  %v151_v44 = vrot.slane %v1066_v35, %v150_v43 }
   0xc   :  { %927 = vmatprep.subr.bf16.mxu0 %v1047_v12  ;;  %v1062_v27 = vld [vmem:[%s1390_s1 + $0xb0] sm:$0xff]   ;;  %v1072_v32 = vld [vmem:[%s1390_s1 + $0xb8] sm:$0xff]   ;;  %v158_v46 = vrot.slane %v1068_v36, %v150_v43  ;;  %v1074_v53 = vld [vmem:[%s1390_s1 + $0x100] sm:$0xff]  }
   0xd   :  { %948 = vmatpush3.bf16.msra.mxu1 %v1046_v11  ;;  %v1071_v37 = vld [vmem:[%s1389_s0 + $0x12] ss:$7 sps:$4 sm:$0x77]   ;;  %v1069_v41 = vld [vmem:[%s1389_s0 + $0xe] ss:$7 sps:$4 sm:$0xff]   ;;  %v1089_v0 = vld [vmem:[%s1390_s1 + $0x180] sm:$0xff]  }
   0xe   :  { %949 = vmatprep.subr.bf16.mxu1 %v1049_v14  ;;  %v165_v45 = vrot.slane %v1069_v41, %v150_v43  ;;  %v172_v47 = vrot.slane %v1071_v37, %v150_v43  ;;  %v1075_v54 = vld [vmem:[%s1390_s1 + $0x148] sm:$0xff]   ;;  %v1077_v60 = vld [vmem:[%s1390_s1 + $0x150] sm:$0xff]   ;;  %v1079_v63 = vld [vmem:[%s1390_s1 + $0x158] sm:$0xff]  }
   0xf   :  { %928 = vmatpush3.bf16.msra.mxu0 %v1048_v13  ;;  %v1076_v59 = vld [vmem:[%s1390_s1 + $0x108] sm:$0xff]   ;;  %v1078_v62 = vld [vmem:[%s1390_s1 + $0x110] sm:$0xff]   ;;  %v1080_v2 = vld [vmem:[%s1390_s1 + $0x118] sm:$0xff]  }
  0x10   :  { %929 = vmatprep.subr.bf16.mxu0 %v1051_v16  ;;  %v174_v48 = vcombine.high %v151_v44, %v165_v45  ;;  %v173_v49 = vcombine.low %v151_v44, %v165_v45  ;;  %v176_v50 = vcombine.high %v158_v46, %v172_v47  ;;  %v175_v55 = vcombine.low %v158_v46, %v172_v47  ;;  %v1081_v3 = vld [vmem:[%s1390_s1 + $0x160] sm:$0xff]   ;;  %v1083_v5 = vld [vmem:[%s1390_s1 + $0x168] sm:$0xff]   ;;  %v1085_v7 = vld [vmem:[%s1390_s1 + $0x170] sm:$0xff]  }
  0x11   :  { %950 = vmatpush3.bf16.msra.mxu1 %v1050_v15  ;;  %v1082_v4 = vld [vmem:[%s1390_s1 + $0x120] sm:$0xff]   ;;  %v1084_v6 = vld [vmem:[%s1390_s1 + $0x128] sm:$0xff]   ;;  %v1086_v8 = vld [vmem:[%s1390_s1 + $0x130] sm:$0xff]  }
  0x12   :  { %951 = vmatprep.subr.bf16.mxu1 %v1053_v18  ;;  %v197_v51 = vrot.slane %v174_v48, %v150_v43  ;;  %v183_v52 = vrot.slane %v173_v49, %v150_v43  ;;  %v204_v58 = vrot.slane %v176_v50, %v150_v43  ;;  %v190_v61 = vrot.slane %v175_v55, %v150_v43  ;;  %v1087_v9 = vld [vmem:[%s1390_s1 + $0x178] sm:$0xff]   ;;  %v1090_v11 = vld [vmem:[%s1392_s3] sm:$0xff]   ;;  %v1091_v12 = vld [vmem:[%s1392_s3 + $0x8] sm:$0xff]  }
  0x13   :  { %930 = vmatpush3.bf16.msra.mxu0 %v1052_v17  ;;  %v1088_v10 = vld [vmem:[%s1390_s1 + $0x138] sm:$0xff]   ;;  %v1092_v13 = vld [vmem:[%s1392_s3 + $0x10] sm:$0xff]   ;;  %v858_v16 = vld [vmem:[%s1391_s2] ss:$0 sm:$0xff] }
  0x14   :  { %931 = vmatprep.subr.bf16.mxu0 %v1055_v20  ;;  %544 = vmatprep.mubr.bf16.mxu0 %v197_v51  ;;  %v207_v56 = vcombine.high %v197_v51, %v197_v51  ;;  %v205_v57 = vcombine.high %v183_v52, %v183_v52  ;;  %v206_v1 = vcombine.high %v190_v61, %v190_v61  ;;  %v1093_v14 = vld [vmem:[%s1392_s3 + $0x18] sm:$0xff]   ;;  %v1094_v41 = vld [vmem:[%s1394_s5] sm:$0xff]   ;;  %v1095_v43 = vld [vmem:[%s1394_s5 + $0x8] sm:$0xff]  }
  0x15   :  { %952 = vmatpush3.bf16.msra.mxu1 %v1054_v19  ;;  %v1096_v44 = vld [vmem:[%s1394_s5 + $0x10] sm:$0xff]   ;;  %v1097_v45 = vld [vmem:[%s1394_s5 + $0x18] sm:$0xff]   ;;  %v909_v46 = vld [vmem:[%s1393_s4] ss:$0 sm:$0xff] }
  0x16   :  { %953 = vmatprep.subr.bf16.mxu1 %v1057_v22  ;;  %584 = vmatprep.mubr.bf16.mxu1 %v207_v56 }
  0x17   :  { %932 = vmatpush3.bf16.msra.mxu0 %v1056_v21 }
  0x18   :  { %933 = vmatprep.subr.bf16.mxu0 %v1059_v24 }
  0x19   :  { %954 = vmatpush3.bf16.msra.mxu1 %v1058_v23 }
  0x1a   :  { %955 = vmatprep.subr.bf16.mxu1 %v1061_v26 }
  0x1b   :  { %934 = vmatpush3.bf16.msra.mxu0 %v1060_v25 }
  0x1c   :  { %935 = vmatprep.subr.bf16.mxu0 %v1063_v28 }
  0x1d   :  { %956 = vmatpush3.bf16.msra.mxu1 %v1062_v27 }
  0x1e   :  { %957 = vmatprep.subr.bf16.mxu1 %v1065_v31 }
  0x1f   :  { %936 = vmatpush3.bf16.msra.mxu0 %v1064_v29 }
  0x20   :  { %965 = vmatprep.subr.bf16.mxu0 %v1073_v34 }
  0x21   :  { %958 = vmatpush3.bf16.msra.mxu1 %v1072_v32 }
  0x22   :  { %999 = vmatprep.subr.bf16.mxu1 %v1123_v40  ;;  %545 = vmatmul.mubr.bf16.vlgmr.msra.gmra.mrb[0].mxu0 %v183_v52 }
  0x23   :  { %966 = vmatpush3.bf16.msra.mxu0 %v1074_v53  ;;  %624 = vmatprep.mubr.bf16.mxu0 %v204_v58 }
  0x24   :  { %585 = vmatmul.mubr.bf16.vlgmr.msra.gmra.mrb[0].mxu1 %v205_v57  ;;  %967 = vmatprep.subr.bf16.mxu0 %v1075_v54 }
  0x25   :  { %1001 = vmatprep.mubr.msk.bf16.mxu1 %vm1124_vm0, %v1123_v40  ;;  %1000 = vmatpush3.bf16.msra.mxu1 %v1089_v0 }
  0x26   :  { %1005 = vmatprep.subr.bf16.mxu1 %v1123_v40 }
  0x27   :  { %968 = vmatpush3.bf16.msra.mxu0 %v1076_v59 }
  0x28   :  { %969 = vmatprep.subr.bf16.mxu0 %v1077_v60 }
  0x2b   :  { %970 = vmatpush3.bf16.msra.mxu0 %v1078_v62 }
  0x2c   :  { %971 = vmatprep.subr.bf16.mxu0 %v1079_v63  ;;  %1002 = vmatmul.mubr.msk.bf16.vlgmr.msra.gmra.mrb[4].mxu1 %vm508_vm1, %v206_v1 }
  0x2d   :  { %1013 = vmatprep.mubr.msk.bf16.mxu1 %vm1124_vm0, %v1123_v40  ;;  %1006 = vmatpush3.bf16.msra.mxu1 %v1090_v11 }
  0x2e   :  { %1007 = vmatprep.subr.bf16.mxu1 %v1123_v40 }
  0x2f   :  { %972 = vmatpush3.bf16.msra.mxu0 %v1080_v2 }
  0x30   :  { %973 = vmatprep.subr.bf16.mxu0 %v1081_v3 }
  0x31   :  { %1008 = vmatpush3.bf16.msra.mxu1 %v1091_v12 }
  0x32   :  { %1009 = vmatprep.subr.bf16.mxu1 %v1123_v40 }
  0x33   :  { %974 = vmatpush3.bf16.msra.mxu0 %v1082_v4 }
  0x34   :  { %975 = vmatprep.subr.bf16.mxu0 %v1083_v5 }
  0x35   :  { %1010 = vmatpush3.bf16.msra.mxu1 %v1092_v13 }
  0x36   :  { %1011 = vmatprep.subr.bf16.mxu1 %v1123_v40 }
  0x37   :  { %976 = vmatpush3.bf16.msra.mxu0 %v1084_v6 }
  0x38   :  { %977 = vmatprep.subr.bf16.mxu0 %v1085_v7 }
  0x39   :  { %1012 = vmatpush3.bf16.msra.mxu1 %v1093_v14 }
  0x3a   :  { %1017 = vmatprep.subr.bf16.mxu1 %v1123_v40 }
  0x3b   :  { %978 = vmatpush3.bf16.msra.mxu0 %v1086_v8 }
  0x3c   :  { %979 = vmatprep.subr.bf16.mxu0 %v1087_v9 }
  0x3f   :  { %980 = vmatpush3.bf16.msra.mxu0 %v1088_v10 }
  0x42   :  { %625 = vmatmul.mubr.bf16.vlgmr.msra.gmra.mrb[4].mxu0 %v190_v61 }
  0xf5   :  { %v937_v15 = vpop.f32.mrb[0].mxu0 }
  0xf6   :  { %v938_v17 = vpop.f32.mrb[1].mxu0 }
  0xf7   :  { %v939_v18 = vadd.f32 %v938_v17, %v937_v15  ;;  %v940_v19 = vpop.f32.mrb[2].mxu0  ;;  %v959_v20 = vpop.f32.mrb[0].mxu1 }
  0xf8   :  { %v941_v21 = vpop.f32.mrb[3].mxu0  ;;  %v960_v22 = vpop.f32.mrb[1].mxu1 }
  0xf9   :  { %v547_v23 = vadd.f32 %v939_v18, %v858_v16  ;;  %v961_v24 = vadd.f32 %v960_v22, %v959_v20  ;;  %v962_v25 = vpop.f32.mrb[2].mxu1 }
  0xfa   :  { %v963_v26 = vpop.f32.mrb[3].mxu1 }
  0xfb   :  { %v587_v27 = vadd.f32 %v961_v24, %v547_v23 }
  0xff   :  { %v666_v28 = vpop.f32.mrb[4].mxu1 }
 0x100   :  { %v1003_v29 = vpop.f32.mrb[5].mxu1 }
 0x101   :  { %v669_v30 = vpop.f32.mrb[6].mxu1 }
 0x102   :  { %v1004_v31 = vpop.f32.mrb[7].mxu1 }
 0x115   :  { %v981_v32 = vpop.f32.mrb[4].mxu0 }
 0x116   :  { %v982_v33 = vpop.f32.mrb[5].mxu0 }
 0x117   :  { %v983_v34 = vadd.f32 %v982_v33, %v981_v32  ;;  %v984_v35 = vpop.f32.mrb[6].mxu0 }
 0x118   :  { %v985_v36 = vpop.f32.mrb[7].mxu0 }
 0x119   :  { %v627_v37 = vadd.f32 %v983_v34, %v587_v27 }
 0x11b   :  { %v667_v38 = vadd.f32 %v666_v28, %v627_v37 }
 0x11d   :  { %v672_v39 = vmax.f32 %v667_v38, 0.0 }
 0x11f   :  { %v673_v42 = vpack.c.bf16 %v672_v39, %v672_v39 }
 0x121   :  { %1014 = vmatmul.mubr.msk.bf16.vlgmr.msra.gmra.mrb[8].mxu1 %vm713_vm2, %v673_v42 }
 0x122   :  { %1018 = vmatpush3.bf16.msra.mxu1 %v1094_v41  ;;  %1025 = vmatprep.mubr.msk.bf16.mxu1 %vm1124_vm0, %v1123_v40 }
 0x123   :  { %1019 = vmatprep.subr.bf16.mxu1 %v1123_v40 }
 0x126   :  { %1020 = vmatpush3.bf16.msra.mxu1 %v1095_v43 }
 0x127   :  { %1021 = vmatprep.subr.bf16.mxu1 %v1123_v40 }
 0x12a   :  { %1022 = vmatpush3.bf16.msra.mxu1 %v1096_v44 }
 0x12b   :  { %1023 = vmatprep.subr.bf16.mxu1 %v1123_v40  ;;  %v915_v40 = vld [vmem:[%s1395_s6] ss:$0 sm:$0xff] }
 0x12e   :  { %1024 = vmatpush3.bf16.msra.mxu1 %v1097_v45 }
 0x1f4   :  { %v751_v47 = vpop.f32.mrb[8].mxu1 }
 0x1f5   :  { %v752_v48 = vadd.f32 %v909_v46, %v751_v47  ;;  %v1015_v49 = vpop.f32.mrb[9].mxu1 }
 0x1f6   :  { %v754_v50 = vpop.f32.mrb[10].mxu1 }
 0x1f7   :  { %v757_v51 = vmax.f32 %v752_v48, 0.0  ;;  %v1016_v52 = vpop.f32.mrb[11].mxu1 }
 0x1f9   :  { %v758_v53 = vpack.c.bf16 %v757_v51, %v757_v51 }
 0x1fb   :  { %1026 = vmatmul.mubr.msk.bf16.vlgmr.msra.gmra.mrb[12].mxu1 %vm713_vm2, %v758_v53 }
 0x2ce   :  { %v835_v54 = vpop.f32.mrb[12].mxu1 }
 0x2cf   :  { %v836_v55 = vadd.f32 %v915_v40, %v835_v54  ;;  %v1027_v56 = vpop.f32.mrb[13].mxu1 }
 0x2d0   :  { %v838_v57 = vpop.f32.mrb[14].mxu1 }
 0x2d1   :  { %841 = vst [vmem:[#allocation2] sm:$0xff] %v836_v55  ;;  %v1028_v58 = vpop.f32.mrb[15].mxu1 }
 0x2d2   :  { %846 = vsyncadd [#allocation3], 96  ;;  %s1125_s4 = smov [#allocation2]  }
 0x2d3   :  { %s847_s5 = sshll.u32 %s1125_s4, 4  ;;  %s848_s5 = int_to_ptr.vmem [resolvable:$true] %s847_s5 }
 0x2d4   :  { %s1098_s9 = scalar_lea.vmem %s848_s5, 32  ;;  %s1102_s0 = scalar_lea.vmem %s848_s5, 128 }
 0x2d5   :  { %p1099_p0 = scmp.ne.s32.totalorder %s848_s5, %s1098_s9  ;;  %p1103_p1 = scmp.lt.s32.totalorder %s848_s5, %s848_s5 }
 0x2d6   :  { %p1104_p2 = scmp.lt.s32.totalorder %s1102_s0, %s1098_s9 }
 0x2d8   :  { %p1105_p3 = por %p1104_p2, %p1103_p1 }
 0x2da   :  { %p1106_p4 = pnand %p1105_p3, %p1099_p0 }
 0x2dc   :  { %1109 = shalt.err (!%p1106_p4)
}
 0x2dd   :  { %s1110_s11 = scalar_lea.hbm %s1396_s7, 32 }
 0x2de   :  { %p1111_p5 = scmp.ne.s32.totalorder %s1396_s7, %s1110_s11  ;;  %p1114_p6 = scmp.lt.u32.totalorder %s1110_s11, %s1396_s7 }
 0x2e0   :  { %p1116_p7 = pnand %p1114_p6, %p1111_p5 }
 0x2e2   :  { %1119 = shalt.err (!%p1116_p7)
}
 0x2e3   :  { %s1126_s16 = smov 32   ;;  %s1127_s17 = smov 2  }
 0x2e4   :  { %853 = dma.vmem_to_hbm [thread:$0]  %s848_s5, 32, %s1396_s7, [#allocation3], %s1126_s16, %s1126_s16, %s1127_s17  }
 0x2e5   :  { %1120 = dma.done.wait [#allocation3], 128  }
 0x2e6   :  { %1121 = vsyncadd [#allocation3], 4294967168 }
 0x2e7   :  { %857 = vsyncpa [#allocation3], 1 }

</bundles_post_ra>
